<compile_context>
chip_gen: v7x
topology: tpu7x:2x2x1
jax: 0.10.0
libtpu: 0.0.40
codegen_flags: <defaults>
</compile_context>

<pallas_src>
import functools

import jax
import jax.numpy as jnp
from jax.experimental import pallas as pl
from jax.experimental.pallas import tpu as pltpu


# ----------------------------------------------------------------------------
# Fused Pallas kernel
# ----------------------------------------------------------------------------
def _tfood_fused_kernel(
    tokens_ref,      # [B*S, 1]  int32
    tok_emb_ref,     # [V, H]    bf16
    rec_pool_ref,    # [B, B*S]  bf16  (block-diagonal 1/S)
    rec_w_ref,       # [H, Dr]   bf16
    rec_b_ref,       # [1, Dr]   f32
    patches_ref,     # [B*P, patch_dim] bf16
    patch_w_ref,     # [patch_dim, Di]  bf16
    patch_b_ref,     # [1, Di]   f32
    img_pool_ref,    # [B, B*P]  bf16  (block-diagonal 1/P)
    cls_ref,         # [1, Di]   f32
    pw_rec_ref,      # [Dr, 128] bf16  (zero-padded past dim_emb)
    pb_rec_ref,      # [1, 128]  f32
    pw_img_ref,      # [Di, 128] bf16
    pb_img_ref,      # [1, 128]  f32
    out_ref,         # [R, 128]  f32   rows 0:B recipe, B:2B image, rest zero
):
    f32 = jnp.float32
    bf16 = jnp.bfloat16

    # ---- recipe branch: embedding gather (one-hot matmul) + mean pool ------
    bs = tokens_ref.shape[0]
    vocab = tok_emb_ref.shape[0]
    vocab_ids = jax.lax.broadcasted_iota(jnp.int32, (bs, vocab), 1)
    onehot = jnp.where(tokens_ref[...] == vocab_ids, 1.0, 0.0).astype(bf16)
    tok_vecs = jnp.dot(onehot, tok_emb_ref[...],
                       preferred_element_type=f32)                 # [B*S, H]
    pooled = jnp.dot(rec_pool_ref[...], tok_vecs.astype(bf16),
                     preferred_element_type=f32)                   # [B, H]
    rec_feat = jnp.dot(pooled.astype(bf16), rec_w_ref[...],
                       preferred_element_type=f32) + rec_b_ref[...]  # [B, Dr]

    # ---- image branch: patch projection + CLS (= cls_tok + mean patches) ---
    patch_tok = (jnp.dot(patches_ref[...], patch_w_ref[...],
                         preferred_element_type=f32)
                 + patch_b_ref[...])                               # [B*P, Di]
    img_feat = cls_ref[...] + jnp.dot(img_pool_ref[...],
                                      patch_tok.astype(bf16),
                                      preferred_element_type=f32)  # [B, Di]

    # ---- head: tanh(Linear(.)) then L2-normalize (F.normalize, eps=1e-12) --
    def _proj_tanh_norm(x, w, b):
        y = jnp.tanh(jnp.dot(x.astype(bf16), w,
                             preferred_element_type=f32) + b)      # [B, 128]
        # padded lanes have w=b=0 -> tanh(0)=0 -> contribute nothing to ssq
        ssq = jnp.sum(y * y, axis=-1, keepdims=True)
        return y * jax.lax.rsqrt(jnp.maximum(ssq, 1e-24))          # EUP rsqrt

    rec_out = _proj_tanh_norm(rec_feat, pw_rec_ref[...], pb_rec_ref[...])
    img_out = _proj_tanh_norm(img_feat, pw_img_ref[...], pb_img_ref[...])

    b = rec_out.shape[0]
    lanes = out_ref.shape[1]
    slab = jnp.concatenate([rec_out, img_out], axis=0)             # [2B, 128]
    pad_rows = out_ref.shape[0] - 2 * b
    if pad_rows > 0:                                               # static pad
        slab = jnp.concatenate(
            [slab, jnp.zeros((pad_rows, lanes), f32)], axis=0)
    out_ref[...] = slab                                            # dense store


# ----------------------------------------------------------------------------
# Wrapper
# ----------------------------------------------------------------------------
def _round_up(x, m):
    return ((x + m - 1) // m) * m


def tfood_clip_forward(params, recipe_tokens, img, *, patch_size=8):
    f32 = jnp.float32
    bf16 = jnp.bfloat16

    B, S = recipe_tokens.shape
    _, C, H, W = img.shape
    ph, pw = H // patch_size, W // patch_size
    P = ph * pw
    dim_emb = params["proj_rec_w"].shape[1]
    LANES = _round_up(dim_emb, 128)
    ROWS = max(8, _round_up(2 * B, 8))

    # layout-only prep (XLA): patchify NCHW -> [B*P, patch_dim]
    patches = img.reshape(B, C, ph, patch_size, pw, patch_size)
    patches = patches.transpose(0, 2, 4, 1, 3, 5)
    patches = patches.reshape(B * P, C * patch_size * patch_size).astype(bf16)

    tokens2d = recipe_tokens.reshape(B * S, 1).astype(jnp.int32)

    # block-diagonal mean-pool matrices (1/S and 1/P are powers of two -> exact)
    rec_pool = jnp.kron(jnp.eye(B, dtype=f32),
                        jnp.full((1, S), 1.0 / S, f32)).astype(bf16)
    img_pool = jnp.kron(jnp.eye(B, dtype=f32),
                        jnp.full((1, P), 1.0 / P, f32)).astype(bf16)

    # projection weights / biases zero-padded to a lane-dense 128-wide slab
    pad = LANES - dim_emb
    pw_rec = jnp.pad(params["proj_rec_w"], ((0, 0), (0, pad))).astype(bf16)
    pw_img = jnp.pad(params["proj_img_w"], ((0, 0), (0, pad))).astype(bf16)
    pb_rec = jnp.pad(params["proj_rec_b"], (0, pad)).reshape(1, LANES).astype(f32)
    pb_img = jnp.pad(params["proj_img_b"], (0, pad)).reshape(1, LANES).astype(f32)

    vspec = pl.BlockSpec(memory_space=pltpu.MemorySpace.VMEM)
    slab = pl.pallas_call(
        _tfood_fused_kernel,
        in_specs=[vspec] * 14,
        out_specs=vspec,
        out_shape=jax.ShapeDtypeStruct((ROWS, LANES), f32),
    )(
        tokens2d,
        params["tok_emb"].astype(bf16),
        rec_pool,
        params["rec_w"].astype(bf16),
        params["rec_b"].reshape(1, -1).astype(f32),
        patches,
        params["patch_w"].astype(bf16),
        params["patch_b"].reshape(1, -1).astype(f32),
        img_pool,
        params["cls_tok"].reshape(1, -1).astype(f32),
        pw_rec, pb_rec, pw_img, pb_img,
    )

    return {
        "recipe_embedding": slab[:B, :dim_emb],
        "image_embedding": slab[B:2 * B, :dim_emb],
    }


# ----------------------------------------------------------------------------
# Pure-JAX reference (same bf16-in / f32-accumulate precision policy)
# ----------------------------------------------------------------------------
def tfood_clip_forward_ref(params, recipe_tokens, img, *, patch_size=8):
    f32 = jnp.float32
    bf16 = jnp.bfloat16

    emb = jnp.take(params["tok_emb"].astype(bf16), recipe_tokens,
                   axis=0).astype(f32)                       # [B, S, H]
    pooled = jnp.mean(emb, axis=1)                           # [B, H]
    rec_feat = jnp.dot(pooled.astype(bf16), params["rec_w"].astype(bf16),
                       preferred_element_type=f32) + params["rec_b"]

    B, C, H, W = img.shape
    ph, pw = H // patch_size, W // patch_size
    P = ph * pw
    patches = img.reshape(B, C, ph, patch_size, pw, patch_size)
    patches = patches.transpose(0, 2, 4, 1, 3, 5).reshape(B * P, -1).astype(bf16)
    patch_tok = jnp.dot(patches, params["patch_w"].astype(bf16),
                        preferred_element_type=f32) + params["patch_b"]
    patch_tok = patch_tok.astype(bf16).astype(f32).reshape(B, P, -1)
    img_feat = params["cls_tok"] + jnp.mean(patch_tok, axis=1)

    def head(x, w, b):
        y = jnp.tanh(jnp.dot(x.astype(bf16), w.astype(bf16),
                             preferred_element_type=f32) + b)
        n = jnp.maximum(jnp.linalg.norm(y, axis=-1, keepdims=True), 1e-12)
        return y / n

    return {
        "recipe_embedding": head(rec_feat, params["proj_rec_w"],
                                 params["proj_rec_b"]),
        "image_embedding": head(img_feat, params["proj_img_w"],
                                params["proj_img_b"]),
    }


# ----------------------------------------------------------------------------
# Parameter construction (deterministic, in-script)
# ----------------------------------------------------------------------------
def init_params(key, vocab_size, dim_emb, hidden_size, vision_width,
                img_channels, patch_size):
    ks = jax.random.split(key, 8)
    patch_dim = img_channels * patch_size * patch_size
    dim_recipe = hidden_size          # recipe_embedder.dim_recipe
    dim_img_out = vision_width        # image_embedder.dim_out
    return {
        # synthetic recipe embedder
        "tok_emb":    jax.random.normal(ks[0], (vocab_size, hidden_size)) * 0.02,
        "rec_w":      jax.random.normal(ks[1], (hidden_size, dim_recipe)) * 0.05,
        "rec_b":      jnp.zeros((dim_recipe,), jnp.float32),
        # synthetic image embedder (patch projection + CLS)
        "patch_w":    jax.random.normal(ks[2], (patch_dim, dim_img_out)) * 0.02,
        "patch_b":    jnp.zeros((dim_img_out,), jnp.float32),
        "cls_tok":    jax.random.normal(ks[3], (1, dim_img_out)) * 0.02,
        # TFoodClip projections (nn.Linear(in, dim_emb); stored as [in, out])
        "proj_rec_w": jax.random.normal(ks[4], (dim_recipe, dim_emb)) * 0.05,
        "proj_rec_b": jax.random.normal(ks[5], (dim_emb,)) * 0.01,
        "proj_img_w": jax.random.normal(ks[6], (dim_img_out, dim_emb)) * 0.05,
        "proj_img_b": jax.random.normal(ks[7], (dim_emb,)) * 0.01,
    }


# ----------------------------------------------------------------------------
if __name__ == "__main__":
    vocab_size, dim_emb, hidden_size = 50, 32, 32
    num_heads, num_layers, vision_width = 4, 1, 48
    B, seq_len = 2, 8
    img_channels, img_hw, patch_size = 3, 16, 8

    key = jax.random.PRNGKey(0)
    k_par, k_rec, k_img = jax.random.split(key, 3)

    params = init_params(k_par, vocab_size, dim_emb, hidden_size, vision_width,
                         img_channels, patch_size)

    recipe = jax.random.randint(k_rec, (B, seq_len), 0, vocab_size)
    img = jax.random.normal(k_img, (B, img_channels, img_hw, img_hw),
                            dtype=jnp.float32)

    fwd = jax.jit(functools.partial(tfood_clip_forward, patch_size=patch_size))
    out = fwd(params, recipe, img)
    jax.block_until_ready(out)

    ref = tfood_clip_forward_ref(params, recipe, img, patch_size=patch_size)

    assert out["recipe_embedding"].shape == (B, dim_emb)
    assert out["image_embedding"].shape == (B, dim_emb)
    for name in ("recipe_embedding", "image_embedding"):
        # embeddings are L2-normalized
        assert jnp.allclose(jnp.linalg.norm(out[name], axis=-1), 1.0, atol=1e-3)
        # match the pure-JAX reference
        assert jnp.allclose(out[name], ref[name], atol=1e-3, rtol=1e-3)
    print("KERNEL_OK")
</pallas_src>

<mosaic_0001>
module attributes {stable_mosaic.version = 11 : i64} {
  func.func @_tfood_fused_kernel(%arg0: memref<16x1xi32, #tpu.memory_space<vmem>>, %arg1: memref<50x32xbf16, #tpu.memory_space<vmem>>, %arg2: memref<2x16xbf16, #tpu.memory_space<vmem>>, %arg3: memref<32x32xbf16, #tpu.memory_space<vmem>>, %arg4: memref<1x32xf32, #tpu.memory_space<vmem>>, %arg5: memref<8x192xbf16, #tpu.memory_space<vmem>>, %arg6: memref<192x48xbf16, #tpu.memory_space<vmem>>, %arg7: memref<1x48xf32, #tpu.memory_space<vmem>>, %arg8: memref<2x8xbf16, #tpu.memory_space<vmem>>, %arg9: memref<1x48xf32, #tpu.memory_space<vmem>>, %arg10: memref<32x128xbf16, #tpu.memory_space<vmem>>, %arg11: memref<1x128xf32, #tpu.memory_space<vmem>>, %arg12: memref<48x128xbf16, #tpu.memory_space<vmem>>, %arg13: memref<1x128xf32, #tpu.memory_space<vmem>>, %arg14: memref<8x128xf32, #tpu.memory_space<vmem>>) attributes {dimension_semantics = [], scalar_prefetch = 0 : i64, scratch_operands = 0 : i64, tpu.core_type = #tpu.core_type<tc>} {
    %0 = tpu.iota {dimensions = array<i32: 1>} : vector<16x50xi32>
    %c0 = arith.constant 0 : index
    %c0_0 = arith.constant 0 : index
    %1 = vector.load %arg0[%c0, %c0_0] : memref<16x1xi32, #tpu.memory_space<vmem>>, vector<16x1xi32>
    %2 = vector.broadcast %1 : vector<16x1xi32> to vector<16x50xi32>
    %3 = arith.cmpi eq, %2, %0 : vector<16x50xi32>
    %cst = arith.constant 1.000000e+00 : f32
    %cst_1 = arith.constant 0.000000e+00 : f32
    %4 = vector.broadcast %cst : f32 to vector<16x50xf32>
    %5 = vector.broadcast %cst_1 : f32 to vector<16x50xf32>
    %6 = arith.select %3, %4, %5 : vector<16x50xi1>, vector<16x50xf32>
    %7 = arith.truncf %6 : vector<16x50xf32> to vector<16x50xbf16>
    %c0_2 = arith.constant 0 : index
    %c0_3 = arith.constant 0 : index
    %8 = vector.load %arg1[%c0_2, %c0_3] : memref<50x32xbf16, #tpu.memory_space<vmem>>, vector<50x32xbf16>
    %cst_4 = arith.constant dense<0.000000e+00> : vector<16x32xf32>
    %9 = tpu.matmul %7, %8, %cst_4 {dimension_numbers = #tpu.dot_dimension_numbers<[1], [0], [0], [1], [0, 0, 1, 1], [], []>} : vector<16x50xbf16>, vector<50x32xbf16>, vector<16x32xf32> -> vector<16x32xf32>
    %c0_5 = arith.constant 0 : index
    %c0_6 = arith.constant 0 : index
    %10 = vector.load %arg2[%c0_5, %c0_6] : memref<2x16xbf16, #tpu.memory_space<vmem>>, vector<2x16xbf16>
    %11 = arith.truncf %9 : vector<16x32xf32> to vector<16x32xbf16>
    %cst_7 = arith.constant dense<0.000000e+00> : vector<2x32xf32>
    %12 = tpu.matmul %10, %11, %cst_7 {dimension_numbers = #tpu.dot_dimension_numbers<[1], [0], [0], [1], [0, 0, 1, 1], [], []>} : vector<2x16xbf16>, vector<16x32xbf16>, vector<2x32xf32> -> vector<2x32xf32>
    %13 = arith.truncf %12 : vector<2x32xf32> to vector<2x32xbf16>
    %c0_8 = arith.constant 0 : index
    %c0_9 = arith.constant 0 : index
    %14 = vector.load %arg3[%c0_8, %c0_9] : memref<32x32xbf16, #tpu.memory_space<vmem>>, vector<32x32xbf16>
    %cst_10 = arith.constant dense<0.000000e+00> : vector<2x32xf32>
    %15 = tpu.matmul %13, %14, %cst_10 {dimension_numbers = #tpu.dot_dimension_numbers<[1], [0], [0], [1], [0, 0, 1, 1], [], []>} : vector<2x32xbf16>, vector<32x32xbf16>, vector<2x32xf32> -> vector<2x32xf32>
    %c0_11 = arith.constant 0 : index
    %c0_12 = arith.constant 0 : index
    %16 = vector.load %arg4[%c0_11, %c0_12] : memref<1x32xf32, #tpu.memory_space<vmem>>, vector<1x32xf32>
    %17 = vector.broadcast %16 : vector<1x32xf32> to vector<2x32xf32>
    %18 = arith.addf %15, %17 : vector<2x32xf32>
    %c0_13 = arith.constant 0 : index
    %c0_14 = arith.constant 0 : index
    %19 = vector.load %arg5[%c0_13, %c0_14] : memref<8x192xbf16, #tpu.memory_space<vmem>>, vector<8x192xbf16>
    %c0_15 = arith.constant 0 : index
    %c0_16 = arith.constant 0 : index
    %20 = vector.load %arg6[%c0_15, %c0_16] : memref<192x48xbf16, #tpu.memory_space<vmem>>, vector<192x48xbf16>
    %cst_17 = arith.constant dense<0.000000e+00> : vector<8x48xf32>
    %21 = tpu.matmul %19, %20, %cst_17 {dimension_numbers = #tpu.dot_dimension_numbers<[1], [0], [0], [1], [0, 0, 1, 1], [], []>} : vector<8x192xbf16>, vector<192x48xbf16>, vector<8x48xf32> -> vector<8x48xf32>
    %c0_18 = arith.constant 0 : index
    %c0_19 = arith.constant 0 : index
    %22 = vector.load %arg7[%c0_18, %c0_19] : memref<1x48xf32, #tpu.memory_space<vmem>>, vector<1x48xf32>
    %23 = vector.broadcast %22 : vector<1x48xf32> to vector<8x48xf32>
    %24 = arith.addf %21, %23 : vector<8x48xf32>
    %c0_20 = arith.constant 0 : index
    %c0_21 = arith.constant 0 : index
    %25 = vector.load %arg9[%c0_20, %c0_21] : memref<1x48xf32, #tpu.memory_space<vmem>>, vector<1x48xf32>
    %c0_22 = arith.constant 0 : index
    %c0_23 = arith.constant 0 : index
    %26 = vector.load %arg8[%c0_22, %c0_23] : memref<2x8xbf16, #tpu.memory_space<vmem>>, vector<2x8xbf16>
    %27 = arith.truncf %24 : vector<8x48xf32> to vector<8x48xbf16>
    %cst_24 = arith.constant dense<0.000000e+00> : vector<2x48xf32>
    %28 = tpu.matmul %26, %27, %cst_24 {dimension_numbers = #tpu.dot_dimension_numbers<[1], [0], [0], [1], [0, 0, 1, 1], [], []>} : vector<2x8xbf16>, vector<8x48xbf16>, vector<2x48xf32> -> vector<2x48xf32>
    %29 = vector.broadcast %25 : vector<1x48xf32> to vector<2x48xf32>
    %30 = arith.addf %29, %28 : vector<2x48xf32>
    %c0_25 = arith.constant 0 : index
    %c0_26 = arith.constant 0 : index
    %31 = vector.load %arg10[%c0_25, %c0_26] : memref<32x128xbf16, #tpu.memory_space<vmem>>, vector<32x128xbf16>
    %c0_27 = arith.constant 0 : index
    %c0_28 = arith.constant 0 : index
    %32 = vector.load %arg11[%c0_27, %c0_28] : memref<1x128xf32, #tpu.memory_space<vmem>>, vector<1x128xf32>
    %33 = arith.truncf %18 : vector<2x32xf32> to vector<2x32xbf16>
    %cst_29 = arith.constant dense<0.000000e+00> : vector<2x128xf32>
    %34 = tpu.matmul %33, %31, %cst_29 {dimension_numbers = #tpu.dot_dimension_numbers<[1], [0], [0], [1], [0, 0, 1, 1], [], []>} : vector<2x32xbf16>, vector<32x128xbf16>, vector<2x128xf32> -> vector<2x128xf32>
    %35 = vector.broadcast %32 : vector<1x128xf32> to vector<2x128xf32>
    %36 = arith.addf %34, %35 : vector<2x128xf32>
    %37 = math.tanh %36 : vector<2x128xf32>
    %38 = arith.mulf %37, %37 : vector<2x128xf32>
    %cst_30 = arith.constant dense<0.000000e+00> : vector<2xf32>
    %39 = vector.multi_reduction <add>, %38, %cst_30 [1] : vector<2x128xf32> to vector<2xf32>
    %40 = vector.shape_cast %39 : vector<2xf32> to vector<2x1xf32>
    %cst_31 = arith.constant 1.000000e-24 : f32
    %41 = vector.broadcast %cst_31 : f32 to vector<2x1xf32>
    %42 = arith.maximumf %40, %41 : vector<2x1xf32>
    %43 = math.rsqrt %42 : vector<2x1xf32>
    %44 = vector.broadcast %43 : vector<2x1xf32> to vector<2x128xf32>
    %45 = arith.mulf %37, %44 : vector<2x128xf32>
    %c0_32 = arith.constant 0 : index
    %c0_33 = arith.constant 0 : index
    %46 = vector.load %arg12[%c0_32, %c0_33] : memref<48x128xbf16, #tpu.memory_space<vmem>>, vector<48x128xbf16>
    %c0_34 = arith.constant 0 : index
    %c0_35 = arith.constant 0 : index
    %47 = vector.load %arg13[%c0_34, %c0_35] : memref<1x128xf32, #tpu.memory_space<vmem>>, vector<1x128xf32>
    %48 = arith.truncf %30 : vector<2x48xf32> to vector<2x48xbf16>
    %cst_36 = arith.constant dense<0.000000e+00> : vector<2x128xf32>
    %49 = tpu.matmul %48, %46, %cst_36 {dimension_numbers = #tpu.dot_dimension_numbers<[1], [0], [0], [1], [0, 0, 1, 1], [], []>} : vector<2x48xbf16>, vector<48x128xbf16>, vector<2x128xf32> -> vector<2x128xf32>
    %50 = vector.broadcast %47 : vector<1x128xf32> to vector<2x128xf32>
    %51 = arith.addf %49, %50 : vector<2x128xf32>
    %52 = math.tanh %51 : vector<2x128xf32>
    %53 = arith.mulf %52, %52 : vector<2x128xf32>
    %cst_37 = arith.constant dense<0.000000e+00> : vector<2xf32>
    %54 = vector.multi_reduction <add>, %53, %cst_37 [1] : vector<2x128xf32> to vector<2xf32>
    %55 = vector.shape_cast %54 : vector<2xf32> to vector<2x1xf32>
    %cst_38 = arith.constant 1.000000e-24 : f32
    %56 = vector.broadcast %cst_38 : f32 to vector<2x1xf32>
    %57 = arith.maximumf %55, %56 : vector<2x1xf32>
    %58 = math.rsqrt %57 : vector<2x1xf32>
    %59 = vector.broadcast %58 : vector<2x1xf32> to vector<2x128xf32>
    %60 = arith.mulf %52, %59 : vector<2x128xf32>
    %61 = tpu.concatenate %45, %60 in 0 : vector<2x128xf32>, vector<2x128xf32> -> vector<4x128xf32>
    %cst_39 = arith.constant 0.000000e+00 : f32
    %62 = vector.broadcast %cst_39 : f32 to vector<4x128xf32>
    %63 = tpu.concatenate %61, %62 in 0 : vector<4x128xf32>, vector<4x128xf32> -> vector<8x128xf32>
    %c0_40 = arith.constant 0 : index
    %c0_41 = arith.constant 0 : index
    %64 = vector.load %arg14[%c0_40, %c0_41] : memref<8x128xf32, #tpu.memory_space<vmem>>, vector<8x128xf32>
    tpu.vector_store %arg14[%c0_40, %c0_41], %63 {strides = array<i32>} : memref<8x128xf32, #tpu.memory_space<vmem>>, vector<8x128xf32>,
    return
  }
}

</mosaic_0001>

<bundles_post_ra>
// kernel: tfood_clip_forward.1
= control target key start
LH: loop header
LB: loop body
LE: loop exit
PB: predicated region body
PF: predicated region fallthrough
CT: control target
= control target key end

     0   :  { %v779_v0 = vmov 0   ;;  %v780_v2 = vmov 0.0   ;;  %vm781_vm0 = vmmov 0   ;;  %vm95_vm1 = vcmask 1040384   ;;  %s1006_s0 = inlined_call_operand.vmem [shape: s32[16,1], index: 0, kind: input, shape index: {}]   ;;  %s1007_s1 = inlined_call_operand.vmem [shape: bf16[50,32], index: 1, kind: input, shape index: {}]   ;;  %s1008_s6 = inlined_call_operand.vmem [shape: bf16[192,48], index: 6, kind: input, shape index: {}]   ;;  %s1009_s3 = inlined_call_operand.vmem [shape: bf16[32,32], index: 3, kind: input, shape index: {}]   ;;  %s1010_s5 = inlined_call_operand.vmem [shape: bf16[8,192], index: 5, kind: input, shape index: {}]   ;;  %s1011_s2 = inlined_call_operand.vmem [shape: bf16[2,16], index: 2, kind: input, shape index: {}]   ;;  %s1012_s10 = inlined_call_operand.vmem [shape: bf16[32,128], index: 10, kind: input, shape index: {}]   ;;  %s1013_s7 = inlined_call_operand.vmem [shape: f32[1,48], index: 7, kind: input, shape index: {}]   ;;  %s1014_s8 = inlined_call_operand.vmem [shape: bf16[2,8], index: 8, kind: input, shape index: {}]   ;;  %s1015_s12 = inlined_call_operand.vmem [shape: bf16[48,128], index: 12, kind: input, shape index: {}]   ;;  %s1016_s4 = inlined_call_operand.vmem [shape: f32[1,32], index: 4, kind: input, shape index: {}]   ;;  %s1017_s9 = inlined_call_operand.vmem [shape: f32[1,48], index: 9, kind: input, shape index: {}]   ;;  %s1018_s11 = inlined_call_operand.vmem [shape: f32[1,128], index: 11, kind: input, shape index: {}]   ;;  %s1019_s13 = inlined_call_operand.vmem [shape: f32[1,128], index: 13, kind: input, shape index: {}]   ;;  %s1020_s14 = inlined_call_operand.vmem [shape: f32[8,128], index: 14, kind: output, shape index: {}]  }
   0x1   :  { %745 = vset.pattern.permute.xlu0 %v779_v0  ;;  %v50_v1 = vld [vmem:[%s1006_s0] sm:$0xff]  ;;  %692 = vmatprep.subr.bf16.mxu0 %v780_v2  ;;  %v51_v4 = vld [vmem:[%s1006_s0 + $0x8] sm:$0xff]  ;;  %v748_v6 = vld [vmem:[%s1007_s1 + $0x10] sm:$0xff]   ;;  %v48_v9 = vlaneseq  ;;  %vm91_vm4 = vcmask 408576   ;;  %vm142_vm5 = vcmask 130048   ;;  %vm364_vm6 = vcmask 523264  }
   0x2   :  { %53 = vperm.xlu0 %745, %v50_v1   ;;  %v746_v3 = vld [vmem:[%s1007_s1] sm:$0xff]   ;;  %704 = vmatprep.subr.bf16.mxu1 %v780_v2  ;;  %v747_v5 = vld [vmem:[%s1007_s1 + $0x8] sm:$0xff]   ;;  %v749_v7 = vld [vmem:[%s1007_s1 + $0x18] ss:$0 sps:$4 sm:$0x11]   ;;  %vm210_vm7 = vcmask 261120  }
   0x3   :  { %693 = vmatpush3.bf16.msra.mxu0 %v746_v3  ;;  %700 = vmatprep.mubr.msk.bf16.mxu0 %vm781_vm0, %v780_v2  ;;  %v97_v8 = vsel %vm95_vm1, %v749_v7, 0  ;;  %v49_v10 = vand.u32 127, %v48_v9  ;;  %v764_v16 = vld [vmem:[%s1009_s3] sm:$0xff]   ;;  %v751_v26 = vld [vmem:[%s1008_s6 + $0x8] sm:$0xff]   ;;  %v752_v27 = vld [vmem:[%s1008_s6 + $0x10] sm:$0xff]   ;;  %vm415_vm8 = vcmask 1043456  }
   0x4   :  { %694 = vmatprep.subr.bf16.mxu0 %v780_v2  ;;  %706 = vmatprep.mubr.msk.bf16.mxu1 %vm781_vm0, %v780_v2  ;;  %v254_v20 = vld [vmem:[%s1010_s5] sm:$0xff]  ;;  %v753_v28 = vld [vmem:[%s1008_s6 + $0x18] sm:$0xff]   ;;  %v755_v30 = vld [vmem:[%s1008_s6 + $0x28] sm:$0xff]   ;;  %vm411_vm9 = vcmask 64512   ;;  %vm574_vm10 = vcmask 392192   ;;  %vm535_vm11 = vcmask 1041408  }
   0x5   :  { %v140_v23 = vld [vmem:[%s1011_s2] sm:$0x1]  ;;  %v648_v25 = vcombine.high %v254_v20, %v254_v20  ;;  %v756_v31 = vld [vmem:[%s1008_s6 + $0x30] sm:$0xff]   ;;  %v757_v32 = vld [vmem:[%s1008_s6 + $0x38] sm:$0xff]   ;;  %v647_v37 = vcombine.low %v254_v20, %v254_v20 }
   0x6   :  { %56 = vperm.xlu0 %745, %v51_v4   ;;  %v750_v24 = vld [vmem:[%s1008_s6] sm:$0xff]   ;;  %v759_v34 = vld [vmem:[%s1008_s6 + $0x48] sm:$0xff]   ;;  %v760_v35 = vld [vmem:[%s1008_s6 + $0x50] sm:$0xff]  }
   0x7   :  { %695 = vmatpush3.bf16.msra.mxu0 %v747_v5  ;;  %v754_v29 = vld [vmem:[%s1008_s6 + $0x20] sm:$0xff]   ;;  %v761_v36 = vld [vmem:[%s1008_s6 + $0x58] sm:$0xff]   ;;  %v765_v38 = vld [vmem:[%s1009_s3 + $0x8] sm:$0xff]  }
   0x8   :  { %696 = vmatprep.subr.bf16.mxu0 %v780_v2  ;;  %v758_v33 = vld [vmem:[%s1008_s6 + $0x40] sm:$0xff]   ;;  %v767_v54 = vld [vmem:[%s1012_s10 + $0x8] sm:$0xff]  }
   0x9   :  { %v646_v44 = vld [vmem:[%s1013_s7] ss:$0 sm:$0xff]  ;;  %v769_v63 = vld [vmem:[%s1015_s12 + $0x8] sm:$0xff]  }
   0xa   :  { %v409_v52 = vld [vmem:[%s1014_s8] sm:$0x1] }
   0xb   :  { %697 = vmatpush3.bf16.msra.mxu0 %v748_v6  ;;  %v766_v53 = vld [vmem:[%s1012_s10] sm:$0xff]  }
   0xc   :  { %698 = vmatprep.subr.bf16.mxu0 %v780_v2  ;;  %v642_v55 = vld [vmem:[%s1016_s4] ss:$0 sm:$0xff] }
   0xd   :  { %v768_v60 = vld [vmem:[%s1015_s12] sm:$0xff]  }
   0xe   :  { %v663_v1 = vld [vmem:[%s1017_s9] ss:$0 sm:$0xff] }
   0xf   :  { %699 = vmatpush3.bf16.msra.mxu0 %v97_v8 }
  0x10   :  { %710 = vmatprep.subr.bf16.mxu0 %v780_v2 }
  0x81   :  { %v54_v11 = vpop.permute.xlu0 %53 }
  0x82   :  { %vm58_vm2 = vcmp.eq.s32.totalorder %v54_v11, %v49_v10 }
  0x83   :  { %v60_v13 = vsel %vm58_vm2, 1.0, %v780_v2 }
  0x85   :  { %v57_v12 = vpop.permute.xlu0 %56 }
  0x86   :  { %vm59_vm3 = vcmp.eq.s32.totalorder %v57_v12, %v49_v10 }
  0x87   :  { %v61_v14 = vsel %vm59_vm3, 1.0, %v780_v2 }
  0x88   :  { %v62_v15 = vpack.c.bf16 %v61_v14, %v60_v13  ;;  %v668_v14 = vld [vmem:[%s1019_s13] ss:$0 sm:$0xff] }
  0x8a   :  { %701 = vmatmul.mubr.msk.bf16.vlgmr.msra.gmra.mrb[0].mxu0 %vm91_vm4, %v62_v15 }
  0x8b   :  { %714 = vmatprep.mubr.msk.bf16.mxu0 %vm781_vm0, %v780_v2  ;;  %711 = vmatpush3.bf16.msra.mxu0 %v764_v16 }
  0x8c   :  { %712 = vmatprep.subr.bf16.mxu0 %v780_v2 }
  0x8f   :  { %713 = vmatpush3.bf16.msra.mxu0 %v765_v38 }
  0x90   :  { %718 = vmatprep.subr.bf16.mxu0 %v780_v2 }
 0x15d   :  { %v133_v17 = vpop.f32.mrb[0].mxu0 }
 0x15e   :  { %v702_v18 = vpop.f32.mrb[1].mxu0 }
 0x15f   :  { %v136_v19 = vpop.f32.mrb[2].mxu0 }
 0x160   :  { %v141_v21 = vpack.c.bf16 %v136_v19, %v133_v17  ;;  %v703_v22 = vpop.f32.mrb[3].mxu0 }
 0x162   :  { %705 = vmatpush3.bf16.msra.mxu1 %v141_v21 }
 0x163   :  { %368 = vmatprep.subr.bf16.mxu1 %v779_v0 }
 0x165   :  { %707 = vmatmul.mubr.msk.bf16.vlgmr.msra.gmra.mrb[0].mxu1 %vm142_vm5, %v140_v23 }
 0x166   :  { %369 = vmatpush1.bf16.msra.mxu1 %v750_v24  ;;  %661 = vmatprep.mubr.msk.bf16.mxu1 %vm364_vm6, %v648_v25 }
 0x167   :  { %370 = vmatprep.subr.bf16.mxu1 %v779_v0 }
 0x16a   :  { %371 = vmatpush1.bf16.msra.mxu1 %v751_v26 }
 0x16b   :  { %372 = vmatprep.subr.bf16.mxu1 %v779_v0 }
 0x16e   :  { %373 = vmatpush1.bf16.msra.mxu1 %v752_v27 }
 0x16f   :  { %374 = vmatprep.subr.bf16.mxu1 %v779_v0 }
 0x172   :  { %375 = vmatpush1.bf16.msra.mxu1 %v753_v28 }
 0x173   :  { %376 = vmatprep.subr.bf16.mxu1 %v779_v0 }
 0x176   :  { %377 = vmatpush1.bf16.msra.mxu1 %v754_v29 }
 0x177   :  { %378 = vmatprep.subr.bf16.mxu1 %v779_v0 }
 0x17a   :  { %379 = vmatpush1.bf16.msra.mxu1 %v755_v30 }
 0x17b   :  { %380 = vmatprep.subr.bf16.mxu1 %v779_v0 }
 0x17e   :  { %381 = vmatpush1.bf16.msra.mxu1 %v756_v31 }
 0x17f   :  { %382 = vmatprep.subr.bf16.mxu1 %v779_v0 }
 0x182   :  { %383 = vmatpush1.bf16.msra.mxu1 %v757_v32 }
 0x183   :  { %384 = vmatprep.subr.bf16.mxu1 %v779_v0 }
 0x186   :  { %385 = vmatpush1.bf16.msra.mxu1 %v758_v33 }
 0x187   :  { %386 = vmatprep.subr.bf16.mxu1 %v779_v0 }
 0x18a   :  { %387 = vmatpush1.bf16.msra.mxu1 %v759_v34 }
 0x18b   :  { %388 = vmatprep.subr.bf16.mxu1 %v779_v0 }
 0x18e   :  { %389 = vmatpush1.bf16.msra.mxu1 %v760_v35 }
 0x18f   :  { %390 = vmatprep.subr.bf16.mxu1 %v779_v0  ;;  %v770_v0 = vld [vmem:[%s1015_s12 + $0x10] sm:$0xff]  }
 0x192   :  { %391 = vmatpush1.bf16.msra.mxu1 %v761_v36 }
 0x195   :  { %401 = vmatmul.mubr.bf16.vlgmr.msra.gmra.mrb[4].mxu1 %v647_v37 }
 0x238   :  { %v180_v39 = vpop.f32.mrb[0].mxu1 }
 0x239   :  { %v186_v40 = vpack.c.bf16 %v180_v39, %v180_v39  ;;  %v708_v41 = vpop.f32.mrb[1].mxu1 }
 0x23a   :  { %v183_v42 = vpop.f32.mrb[2].mxu1 }
 0x23b   :  { %v709_v43 = vpop.f32.mrb[3].mxu1  ;;  %715 = vmatmul.mubr.msk.bf16.vlgmr.msra.gmra.mrb[4].mxu0 %vm210_vm7, %v186_v40 }
 0x23c   :  { %720 = vmatprep.mubr.msk.bf16.mxu0 %vm781_vm0, %v780_v2 }
 0x268   :  { %v402_v45 = vpop.f32.mrb[4].mxu1 }
 0x269   :  { %v403_v46 = vadd.f32 %v646_v44, %v402_v45  ;;  %v404_v47 = vpop.f32.mrb[5].mxu1 }
 0x26a   :  { %v405_v48 = vpop.f32.mrb[6].mxu1 }
 0x26b   :  { %v410_v49 = vpack.c.bf16 %v403_v46, %v403_v46  ;;  %v406_v50 = vpop.f32.mrb[7].mxu1 }
 0x26d   :  { %v417_v51 = vsel %vm415_vm8, %v410_v49, 0 }
 0x26e   :  { %719 = vmatpush3.bf16.msra.mxu0 %v417_v51 }
 0x26f   :  { %724 = vmatprep.subr.bf16.mxu0 %v780_v2 }
 0x271   :  { %721 = vmatmul.mubr.msk.bf16.vlgmr.msra.gmra.mrb[8].mxu0 %vm411_vm9, %v409_v52 }
 0x272   :  { %725 = vmatpush3.bf16.msra.mxu0 %v766_v53  ;;  %728 = vmatprep.mubr.msk.bf16.mxu0 %vm781_vm0, %v780_v2 }
 0x273   :  { %726 = vmatprep.subr.bf16.mxu0 %v780_v2 }
 0x276   :  { %727 = vmatpush3.bf16.msra.mxu0 %v767_v54 }
 0x277   :  { %732 = vmatprep.subr.bf16.mxu0 %v780_v2 }
 0x30e   :  { %v248_v56 = vpop.f32.mrb[4].mxu0 }
 0x30f   :  { %v249_v57 = vadd.f32 %v642_v55, %v248_v56  ;;  %v716_v58 = vpop.f32.mrb[5].mxu0 }
 0x310   :  { %v251_v59 = vpop.f32.mrb[6].mxu0 }
 0x311   :  { %v471_v61 = vpack.c.bf16 %v249_v57, %v249_v57  ;;  %v717_v62 = vpop.f32.mrb[7].mxu0 }
 0x313   :  { %729 = vmatmul.mubr.msk.bf16.vlgmr.msra.gmra.mrb[12].mxu0 %vm210_vm7, %v471_v61 }
 0x314   :  { %733 = vmatpush3.bf16.msra.mxu0 %v768_v60  ;;  %738 = vmatprep.mubr.msk.bf16.mxu0 %vm781_vm0, %v780_v2 }
 0x315   :  { %734 = vmatprep.subr.bf16.mxu0 %v780_v2 }
 0x318   :  { %735 = vmatpush3.bf16.msra.mxu0 %v769_v63 }
 0x319   :  { %736 = vmatprep.subr.bf16.mxu0 %v780_v2  ;;  %v664_v2 = vld [vmem:[%s1018_s11] ss:$0 sm:$0xff] }
 0x31c   :  { %737 = vmatpush3.bf16.msra.mxu0 %v770_v0 }
 0x344   :  { %v453_v3 = vpop.f32.mrb[8].mxu0 }
 0x345   :  { %v465_v4 = vadd.f32 %v663_v1, %v453_v3  ;;  %v722_v5 = vpop.f32.mrb[9].mxu0 }
 0x346   :  { %v456_v6 = vpop.f32.mrb[10].mxu0 }
 0x347   :  { %v549_v7 = vpack.c.bf16 %v465_v4, %v465_v4  ;;  %v723_v8 = vpop.f32.mrb[11].mxu0 }
 0x349   :  { %739 = vmatmul.mubr.msk.bf16.vlgmr.msra.gmra.mrb[16].mxu0 %vm574_vm10, %v549_v7 }
 0x3e6   :  { %v527_v9 = vpop.f32.mrb[12].mxu0 }
 0x3e7   :  { %v730_v10 = vpop.f32.mrb[13].mxu0  ;;  %v528_v13 = vadd.f32 %v664_v2, %v527_v9 }
 0x3e8   :  { %v530_v11 = vpop.f32.mrb[14].mxu0 }
 0x3e9   :  { %v731_v12 = vpop.f32.mrb[15].mxu0  ;;  %771 = vtanh.f32 %v528_v13 }
 0x3f3   :  { %v772_v20 = vpop.eup %771 }
 0x3f4   :  { %v534_v24 = vmul.f32 %v772_v20, %v772_v20 }
 0x3f6   :  { %v536_v25 = vsel %vm535_vm11, %v534_v24, 0.0 }
 0x41c   :  { %v612_v15 = vpop.f32.mrb[16].mxu0 }
 0x41d   :  { %v613_v16 = vadd.f32 %v668_v14, %v612_v15  ;;  %v740_v17 = vpop.f32.mrb[17].mxu0 }
 0x41e   :  { %v615_v18 = vpop.f32.mrb[18].mxu0 }
 0x41f   :  { %773 = vtanh.f32 %v613_v16  ;;  %v741_v19 = vpop.f32.mrb[19].mxu0 }
 0x429   :  { %v774_v21 = vpop.eup %773 }
 0x42a   :  { %v619_v22 = vmul.f32 %v774_v21, %v774_v21 }
 0x42c   :  { %v620_v23 = vsel %vm535_vm11, %v619_v22, 0.0 }
 0x42d   :  { %621 = vadd.xlane.f32.xlu1 %v620_v23 }
 0x431   :  { %537 = vadd.xlane.f32.xlu1 %v536_v25 }
 0x4ba   :  { %v622_v26 = vpop.xlane.xlu1 %621 }
 0x4bb   :  { %v623_v27 = vmax.f32 %v622_v26, 1e-24 }
 0x4bd   :  { %775 = vrsqrt.f32 %v623_v27 }
 0x4be   :  { %v538_v28 = vpop.xlane.xlu1 %537 }
 0x4bf   :  { %v539_v29 = vmax.f32 %v538_v28, 1e-24 }
 0x4c1   :  { %777 = vrsqrt.f32 %v539_v29 }
 0x4c7   :  { %v776_v30 = vpop.eup %775 }
 0x4c8   :  { %v625_v31 = vmul.f32 %v776_v30, %v774_v21 }
 0x4ca   :  { %v627_v33 = vrot.slane %v625_v31, 6 }
 0x4cb   :  { %v778_v32 = vpop.eup %777 }
 0x4cc   :  { %v541_v34 = vmul.f32 %v778_v32, %v772_v20 }
 0x4ce   :  { %v629_v35 = vsel %vm535_vm11, %v541_v34, %v627_v33 }
 0x4cf   :  { %v630_v36 = vsel %vm415_vm8, %v629_v35, 0.0 }
 0x4d0   :  { %631 = vst [vmem:[%s1020_s14] sm:$0xff] %v630_v36 }

</bundles_post_ra>
